<compile_context>
chip_gen: v5e
topology: v5e:2x2
jax: 0.10.0
libtpu: 0.0.40
codegen_flags: <defaults>
</compile_context>

<pallas_src>
import functools

import jax
import jax.numpy as jnp
from jax.experimental import pallas as pl
from jax.experimental.pallas import tpu as pltpu


def _conv3x3s2_kernel(x_ref, xnext_ref, w_ref, b_ref, o_ref,
                      *, TH, Wo, C_in, C_out):
    """One (batch*time, row-tile) step of the 3x3/stride-2 spatial conv.

    x_ref:     (1, TH, 2, 2, Wh, C_in)  parity-split padded rows of this tile:
               x_ref[0, m, hp, wp, n, c] == x_pad[2*(t*TH+m)+hp, 2*n+wp, c]
    xnext_ref: (1, 1, 2, 2, Wh, C_in)   halo: first padded row-pair of the next
               row tile (only the kh==2 taps need it).
    w_ref:     (9, C_in, C_out)         tap kh*3+kw -> (C_in, C_out)
    b_ref:     (1, C_out)
    o_ref:     (1, TH, Wo, C_out)
    """
    rows = TH * Wo
    acc = jnp.zeros((rows, C_out), jnp.float32)
    for kh in range(3):
        hp, hoff = kh % 2, kh // 2
        for kw in range(3):
            wp, woff = kw % 2, kw // 2
            if hoff == 0:
                # (TH, Wo, C_in), contiguous slice on major/sublane dims only.
                tap = x_ref[0, :, hp, wp, woff:woff + Wo, :]
            else:
                # kh == 2: rows m+1 -> body rows 1..TH-1 of this tile plus the
                # first row of the next tile (halo view of the same array).
                halo = xnext_ref[0, :, hp, wp, woff:woff + Wo, :]   # (1, Wo, C)
                if TH > 1:
                    body = x_ref[0, 1:TH, hp, wp, woff:woff + Wo, :]
                    tap = jnp.concatenate([body, halo], axis=0)     # (TH, Wo, C)
                else:
                    tap = halo
            # Native-dtype MXU operands (bf16 stays bf16); f32 accumulator.
            acc = acc + jnp.dot(tap.reshape(rows, C_in), w_ref[kh * 3 + kw],
                                preferred_element_type=jnp.float32)
    acc = acc + b_ref[0].astype(jnp.float32)
    o_ref[0] = acc.reshape(TH, Wo, C_out).astype(o_ref.dtype)


def _pick_row_tile(Ho, Wo, Wh, c_in, c_out, itemsize):
    """Output-row tile: f32 accumulator <= ~128 KiB and the double-buffered
    VMEM working set within ~32 MiB (fits v7x's 64 MiB VMEM with headroom)."""
    acc_rows = max(1, (128 * 1024) // (Wo * c_out * 4))
    per_row_in = 2 * 2 * Wh * c_in * itemsize          # one h-half row, both parities
    per_row_out = Wo * c_out * itemsize
    fixed = 2 * 2 * per_row_in                         # double-buffered halo blocks
    fixed += 9 * c_in * c_out * itemsize + 128 * 4     # resident weights + bias
    budget = 32 * 1024 * 1024
    vmem_rows = max(1, (budget - fixed) // (2 * (per_row_in + per_row_out)))
    return int(max(1, min(Ho, acc_rows, vmem_rows)))


@functools.partial(jax.jit, static_argnames=("row_tile",))
def spatial_downsample2x(x, weight, bias, *, row_tile=None):
    """x: (N, C_in, T, H, W); weight: (C_out, C_in, 1, 3, 3); bias: (C_out,)."""
    N, C_in, T, H, W = x.shape
    C_out = weight.shape[0]
    assert H >= 2 and W >= 2

    # Output extents of the (H+1, W+1)-padded valid 3x3/stride-2 conv.
    Ho = (H - 2) // 2 + 1
    Wo = (W - 2) // 2 + 1
    Wh = Wo + 1                 # half-width incl. pad; kw==2 taps read column Wo
    We = 2 * Wh                 # padded width (>= W+1, extra columns are zero)

    itemsize = jnp.dtype(x.dtype).itemsize
    if row_tile is None:
        TH = _pick_row_tile(Ho, Wo, Wh, C_in, C_out, itemsize)
    else:
        TH = max(1, min(int(row_tile), Ho))
    n_t = pl.cdiv(Ho, TH)
    Ho_pad = n_t * TH           # extra rows read zeros and are sliced off below
    Hh2 = Ho_pad + 1            # +1 h-half row: halo for the last row tile
    Hpe = 2 * Hh2               # padded height (>= H+1, extra rows are zero)
    B = N * T

    # Single fused layout pass (replaces pad + transpose + 4-way parity split):
    #   xr[b, m, hp, wp, n, c] = x_pad[2m+hp, 2n+wp, c]  for slab b=(batch, t).
    xp = jnp.pad(x, ((0, 0), (0, 0), (0, 0), (0, Hpe - H), (0, We - W)))
    xr = xp.reshape(N, C_in, T, Hh2, 2, Wh, 2)
    xr = jnp.transpose(xr, (0, 2, 3, 4, 6, 5, 1))      # (N, T, Hh2, 2h, 2w, Wh, C)
    xr = xr.reshape(B, Hh2, 2, 2, Wh, C_in)

    # (C_out, C_in, 1, 3, 3) -> (9, C_in, C_out); bias -> (1, C_out).
    wr = jnp.transpose(weight[:, :, 0, :, :], (2, 3, 1, 0)).reshape(9, C_in, C_out)
    br = bias.reshape(1, C_out)

    main_spec = pl.BlockSpec((1, TH, 2, 2, Wh, C_in),
                             lambda b, t: (b, t, 0, 0, 0, 0))
    # Halo: the first h-half row of the NEXT row tile, read through a second
    # 1-row BlockSpec over the same array (block index == element index here).
    halo_spec = pl.BlockSpec((1, 1, 2, 2, Wh, C_in),
                             lambda b, t: (b, (t + 1) * TH, 0, 0, 0, 0))

    out = pl.pallas_call(
        functools.partial(_conv3x3s2_kernel, TH=TH, Wo=Wo, C_in=C_in, C_out=C_out),
        out_shape=jax.ShapeDtypeStruct((B, Ho_pad, Wo, C_out), x.dtype),
        grid_spec=pltpu.PrefetchScalarGridSpec(
            num_scalar_prefetch=0,
            grid=(B, n_t),
            in_specs=[
                main_spec,
                halo_spec,
                pl.BlockSpec((9, C_in, C_out), lambda b, t: (0, 0, 0)),
                pl.BlockSpec((1, C_out), lambda b, t: (0, 0)),
            ],
            out_specs=pl.BlockSpec((1, TH, Wo, C_out), lambda b, t: (b, t, 0, 0)),
        ),
        compiler_params=pltpu.CompilerParams(
            dimension_semantics=("parallel", "parallel"),
            vmem_limit_bytes=64 * 1024 * 1024),
    )(xr, xr, wr, br)

    # (B, Ho_pad, Wo, C_out) -> (N, C_out, T, Ho, Wo)  (NCTHW, as PyTorch).
    out = out[:, :Ho].reshape(N, T, Ho, Wo, C_out)
    return jnp.transpose(out, (0, 4, 1, 2, 3))


def reference_forward(x, weight, bias):
    """Pure-JAX reference of the PyTorch forward (for correctness check)."""
    xp = jnp.pad(x, ((0, 0), (0, 0), (0, 0), (0, 1), (0, 1)))
    out = jax.lax.conv_general_dilated(
        xp, weight, window_strides=(1, 2, 2), padding="VALID",
        dimension_numbers=("NCDHW", "OIDHW", "NCDHW"))
    return out + bias[None, :, None, None, None]


if __name__ == "__main__":
    key = jax.random.PRNGKey(0)
    k_x, k_w, k_b = jax.random.split(key, 3)

    # --- test 1: module-sized toy shapes, auto row tile (single tile) --------
    N, C_in, C_out, T, H, W = 2, 4, 8, 3, 16, 16
    x = jax.random.normal(k_x, (N, C_in, T, H, W), jnp.float32)
    weight = 0.1 * jax.random.normal(k_w, (C_out, C_in, 1, 3, 3), jnp.float32)
    bias = 0.1 * jax.random.normal(k_b, (C_out,), jnp.float32)

    out = jax.block_until_ready(spatial_downsample2x(x, weight, bias))
    ref = jax.block_until_ready(reference_forward(x, weight, bias))
    assert out.shape == (N, C_out, T, H // 2, W // 2), out.shape
    assert out.dtype == jnp.float32
    assert jnp.allclose(out, ref, atol=1e-4, rtol=1e-4), float(
        jnp.max(jnp.abs(out - ref)))

    # --- test 2: exercises the multi-row-tile + halo path (n_t > 1) ----------
    N2, C2i, C2o, T2, H2, W2 = 1, 8, 16, 2, 32, 32
    x2 = jax.random.normal(k_x, (N2, C2i, T2, H2, W2), jnp.float32)
    w2 = 0.1 * jax.random.normal(k_w, (C2o, C2i, 1, 3, 3), jnp.float32)
    b2 = 0.1 * jax.random.normal(k_b, (C2o,), jnp.float32)

    out2 = jax.block_until_ready(spatial_downsample2x(x2, w2, b2, row_tile=5))
    ref2 = jax.block_until_ready(reference_forward(x2, w2, b2))
    assert out2.shape == (N2, C2o, T2, H2 // 2, W2 // 2), out2.shape
    assert jnp.allclose(out2, ref2, atol=1e-4, rtol=1e-4), float(
        jnp.max(jnp.abs(out2 - ref2)))

    print("KERNEL_OK")
</pallas_src>

<mosaic_0001>
module attributes {stable_mosaic.version = 11 : i64} {
  func.func @_conv3x3s2_kernel(%arg0: i32, %arg1: i32, %arg2: memref<1x8x2x2x9x4xf32, #tpu.memory_space<vmem>>, %arg3: memref<1x1x2x2x9x4xf32, #tpu.memory_space<vmem>>, %arg4: memref<9x4x8xf32, #tpu.memory_space<vmem>>, %arg5: memref<1x8xf32, #tpu.memory_space<vmem>>, %arg6: memref<1x8x8x8xf32, #tpu.memory_space<vmem>>) attributes {dimension_semantics = [#tpu.dimension_semantics<parallel>, #tpu.dimension_semantics<parallel>], iteration_bounds = array<i64: 6, 1>, scalar_prefetch = 0 : i64, scratch_operands = 0 : i64, tpu.core_type = #tpu.core_type<tc>, window_params = [{transform_indices = @transform_0, window_bounds = array<i64: 1, 8, 2, 2, 9, 4>}, {transform_indices = @transform_1, window_bounds = array<i64: 1, 1, 2, 2, 9, 4>}, {pipeline_mode = #tpu.pipeline_mode<synchronous>, transform_indices = @transform_2, window_bounds = array<i64: 9, 4, 8>}, {pipeline_mode = #tpu.pipeline_mode<synchronous>, transform_indices = @transform_3, window_bounds = array<i64: 1, 8>}, {transform_indices = @transform_4, window_bounds = array<i64: 1, 8, 8, 8>}]} {
    %cst = arith.constant 0.000000e+00 : f32
    %0 = vector.broadcast %cst : f32 to vector<64x8xf32>
    %c0 = arith.constant 0 : index
    %c0_0 = arith.constant 0 : index
    %c0_1 = arith.constant 0 : index
    %c0_2 = arith.constant 0 : index
    %c0_3 = arith.constant 0 : index
    %c0_4 = arith.constant 0 : index
    %1 = vector.load %arg2[%c0, %c0_0, %c0_1, %c0_2, %c0_3, %c0_4] : memref<1x8x2x2x9x4xf32, #tpu.memory_space<vmem>>, vector<1x8x1x1x8x4xf32>
    %2 = vector.shape_cast %1 : vector<1x8x1x1x8x4xf32> to vector<8x8x4xf32>
    %3 = vector.shape_cast %2 : vector<8x8x4xf32> to vector<64x4xf32>
    %c0_5 = arith.constant 0 : index
    %c0_6 = arith.constant 0 : index
    %c0_7 = arith.constant 0 : index
    %4 = vector.load %arg4[%c0_5, %c0_6, %c0_7] : memref<9x4x8xf32, #tpu.memory_space<vmem>>, vector<1x4x8xf32>
    %5 = vector.shape_cast %4 : vector<1x4x8xf32> to vector<4x8xf32>
    %cst_8 = arith.constant dense<0.000000e+00> : vector<64x8xf32>
    %6 = tpu.matmul %3, %5, %cst_8 {dimension_numbers = #tpu.dot_dimension_numbers<[1], [0], [0], [1], [0, 0, 1, 1], [], []>} : vector<64x4xf32>, vector<4x8xf32>, vector<64x8xf32> -> vector<64x8xf32>
    %7 = arith.addf %0, %6 : vector<64x8xf32>
    %c0_9 = arith.constant 0 : index
    %c0_10 = arith.constant 0 : index
    %c0_11 = arith.constant 0 : index
    %c1 = arith.constant 1 : index
    %c0_12 = arith.constant 0 : index
    %c0_13 = arith.constant 0 : index
    %8 = vector.load %arg2[%c0_9, %c0_10, %c0_11, %c1, %c0_12, %c0_13] : memref<1x8x2x2x9x4xf32, #tpu.memory_space<vmem>>, vector<1x8x1x1x8x4xf32>
    %9 = vector.shape_cast %8 : vector<1x8x1x1x8x4xf32> to vector<8x8x4xf32>
    %10 = vector.shape_cast %9 : vector<8x8x4xf32> to vector<64x4xf32>
    %c1_14 = arith.constant 1 : index
    %c0_15 = arith.constant 0 : index
    %c0_16 = arith.constant 0 : index
    %11 = vector.load %arg4[%c1_14, %c0_15, %c0_16] : memref<9x4x8xf32, #tpu.memory_space<vmem>>, vector<1x4x8xf32>
    %12 = vector.shape_cast %11 : vector<1x4x8xf32> to vector<4x8xf32>
    %cst_17 = arith.constant dense<0.000000e+00> : vector<64x8xf32>
    %13 = tpu.matmul %10, %12, %cst_17 {dimension_numbers = #tpu.dot_dimension_numbers<[1], [0], [0], [1], [0, 0, 1, 1], [], []>} : vector<64x4xf32>, vector<4x8xf32>, vector<64x8xf32> -> vector<64x8xf32>
    %14 = arith.addf %7, %13 : vector<64x8xf32>
    %c0_18 = arith.constant 0 : index
    %c0_19 = arith.constant 0 : index
    %c0_20 = arith.constant 0 : index
    %c0_21 = arith.constant 0 : index
    %c1_22 = arith.constant 1 : index
    %c0_23 = arith.constant 0 : index
    %15 = vector.load %arg2[%c0_18, %c0_19, %c0_20, %c0_21, %c1_22, %c0_23] : memref<1x8x2x2x9x4xf32, #tpu.memory_space<vmem>>, vector<1x8x1x1x8x4xf32>
    %16 = vector.shape_cast %15 : vector<1x8x1x1x8x4xf32> to vector<8x8x4xf32>
    %17 = vector.shape_cast %16 : vector<8x8x4xf32> to vector<64x4xf32>
    %c2 = arith.constant 2 : index
    %c0_24 = arith.constant 0 : index
    %c0_25 = arith.constant 0 : index
    %18 = vector.load %arg4[%c2, %c0_24, %c0_25] : memref<9x4x8xf32, #tpu.memory_space<vmem>>, vector<1x4x8xf32>
    %19 = vector.shape_cast %18 : vector<1x4x8xf32> to vector<4x8xf32>
    %cst_26 = arith.constant dense<0.000000e+00> : vector<64x8xf32>
    %20 = tpu.matmul %17, %19, %cst_26 {dimension_numbers = #tpu.dot_dimension_numbers<[1], [0], [0], [1], [0, 0, 1, 1], [], []>} : vector<64x4xf32>, vector<4x8xf32>, vector<64x8xf32> -> vector<64x8xf32>
    %21 = arith.addf %14, %20 : vector<64x8xf32>
    %c0_27 = arith.constant 0 : index
    %c0_28 = arith.constant 0 : index
    %c1_29 = arith.constant 1 : index
    %c0_30 = arith.constant 0 : index
    %c0_31 = arith.constant 0 : index
    %c0_32 = arith.constant 0 : index
    %22 = vector.load %arg2[%c0_27, %c0_28, %c1_29, %c0_30, %c0_31, %c0_32] : memref<1x8x2x2x9x4xf32, #tpu.memory_space<vmem>>, vector<1x8x1x1x8x4xf32>
    %23 = vector.shape_cast %22 : vector<1x8x1x1x8x4xf32> to vector<8x8x4xf32>
    %24 = vector.shape_cast %23 : vector<8x8x4xf32> to vector<64x4xf32>
    %c3 = arith.constant 3 : index
    %c0_33 = arith.constant 0 : index
    %c0_34 = arith.constant 0 : index
    %25 = vector.load %arg4[%c3, %c0_33, %c0_34] : memref<9x4x8xf32, #tpu.memory_space<vmem>>, vector<1x4x8xf32>
    %26 = vector.shape_cast %25 : vector<1x4x8xf32> to vector<4x8xf32>
    %cst_35 = arith.constant dense<0.000000e+00> : vector<64x8xf32>
    %27 = tpu.matmul %24, %26, %cst_35 {dimension_numbers = #tpu.dot_dimension_numbers<[1], [0], [0], [1], [0, 0, 1, 1], [], []>} : vector<64x4xf32>, vector<4x8xf32>, vector<64x8xf32> -> vector<64x8xf32>
    %28 = arith.addf %21, %27 : vector<64x8xf32>
    %c0_36 = arith.constant 0 : index
    %c0_37 = arith.constant 0 : index
    %c1_38 = arith.constant 1 : index
    %c1_39 = arith.constant 1 : index
    %c0_40 = arith.constant 0 : index
    %c0_41 = arith.constant 0 : index
    %29 = vector.load %arg2[%c0_36, %c0_37, %c1_38, %c1_39, %c0_40, %c0_41] : memref<1x8x2x2x9x4xf32, #tpu.memory_space<vmem>>, vector<1x8x1x1x8x4xf32>
    %30 = vector.shape_cast %29 : vector<1x8x1x1x8x4xf32> to vector<8x8x4xf32>
    %31 = vector.shape_cast %30 : vector<8x8x4xf32> to vector<64x4xf32>
    %c4 = arith.constant 4 : index
    %c0_42 = arith.constant 0 : index
    %c0_43 = arith.constant 0 : index
    %32 = vector.load %arg4[%c4, %c0_42, %c0_43] : memref<9x4x8xf32, #tpu.memory_space<vmem>>, vector<1x4x8xf32>
    %33 = vector.shape_cast %32 : vector<1x4x8xf32> to vector<4x8xf32>
    %cst_44 = arith.constant dense<0.000000e+00> : vector<64x8xf32>
    %34 = tpu.matmul %31, %33, %cst_44 {dimension_numbers = #tpu.dot_dimension_numbers<[1], [0], [0], [1], [0, 0, 1, 1], [], []>} : vector<64x4xf32>, vector<4x8xf32>, vector<64x8xf32> -> vector<64x8xf32>
    %35 = arith.addf %28, %34 : vector<64x8xf32>
    %c0_45 = arith.constant 0 : index
    %c0_46 = arith.constant 0 : index
    %c1_47 = arith.constant 1 : index
    %c0_48 = arith.constant 0 : index
    %c1_49 = arith.constant 1 : index
    %c0_50 = arith.constant 0 : index
    %36 = vector.load %arg2[%c0_45, %c0_46, %c1_47, %c0_48, %c1_49, %c0_50] : memref<1x8x2x2x9x4xf32, #tpu.memory_space<vmem>>, vector<1x8x1x1x8x4xf32>
    %37 = vector.shape_cast %36 : vector<1x8x1x1x8x4xf32> to vector<8x8x4xf32>
    %38 = vector.shape_cast %37 : vector<8x8x4xf32> to vector<64x4xf32>
    %c5 = arith.constant 5 : index
    %c0_51 = arith.constant 0 : index
    %c0_52 = arith.constant 0 : index
    %39 = vector.load %arg4[%c5, %c0_51, %c0_52] : memref<9x4x8xf32, #tpu.memory_space<vmem>>, vector<1x4x8xf32>
    %40 = vector.shape_cast %39 : vector<1x4x8xf32> to vector<4x8xf32>
    %cst_53 = arith.constant dense<0.000000e+00> : vector<64x8xf32>
    %41 = tpu.matmul %38, %40, %cst_53 {dimension_numbers = #tpu.dot_dimension_numbers<[1], [0], [0], [1], [0, 0, 1, 1], [], []>} : vector<64x4xf32>, vector<4x8xf32>, vector<64x8xf32> -> vector<64x8xf32>
    %42 = arith.addf %35, %41 : vector<64x8xf32>
    %c0_54 = arith.constant 0 : index
    %c0_55 = arith.constant 0 : index
    %c0_56 = arith.constant 0 : index
    %c0_57 = arith.constant 0 : index
    %c0_58 = arith.constant 0 : index
    %c0_59 = arith.constant 0 : index
    %43 = vector.load %arg3[%c0_54, %c0_55, %c0_56, %c0_57, %c0_58, %c0_59] : memref<1x1x2x2x9x4xf32, #tpu.memory_space<vmem>>, vector<1x1x1x1x8x4xf32>
    %44 = vector.shape_cast %43 : vector<1x1x1x1x8x4xf32> to vector<1x8x4xf32>
    %c0_60 = arith.constant 0 : index
    %c1_61 = arith.constant 1 : index
    %c0_62 = arith.constant 0 : index
    %c0_63 = arith.constant 0 : index
    %c0_64 = arith.constant 0 : index
    %c0_65 = arith.constant 0 : index
    %45 = vector.load %arg2[%c0_60, %c1_61, %c0_62, %c0_63, %c0_64, %c0_65] : memref<1x8x2x2x9x4xf32, #tpu.memory_space<vmem>>, vector<1x7x1x1x8x4xf32>
    %46 = vector.shape_cast %45 : vector<1x7x1x1x8x4xf32> to vector<7x8x4xf32>
    %47 = tpu.concatenate %46, %44 in 0 : vector<7x8x4xf32>, vector<1x8x4xf32> -> vector<8x8x4xf32>
    %48 = vector.shape_cast %47 : vector<8x8x4xf32> to vector<64x4xf32>
    %c6 = arith.constant 6 : index
    %c0_66 = arith.constant 0 : index
    %c0_67 = arith.constant 0 : index
    %49 = vector.load %arg4[%c6, %c0_66, %c0_67] : memref<9x4x8xf32, #tpu.memory_space<vmem>>, vector<1x4x8xf32>
    %50 = vector.shape_cast %49 : vector<1x4x8xf32> to vector<4x8xf32>
    %cst_68 = arith.constant dense<0.000000e+00> : vector<64x8xf32>
    %51 = tpu.matmul %48, %50, %cst_68 {dimension_numbers = #tpu.dot_dimension_numbers<[1], [0], [0], [1], [0, 0, 1, 1], [], []>} : vector<64x4xf32>, vector<4x8xf32>, vector<64x8xf32> -> vector<64x8xf32>
    %52 = arith.addf %42, %51 : vector<64x8xf32>
    %c0_69 = arith.constant 0 : index
    %c0_70 = arith.constant 0 : index
    %c0_71 = arith.constant 0 : index
    %c1_72 = arith.constant 1 : index
    %c0_73 = arith.constant 0 : index
    %c0_74 = arith.constant 0 : index
    %53 = vector.load %arg3[%c0_69, %c0_70, %c0_71, %c1_72, %c0_73, %c0_74] : memref<1x1x2x2x9x4xf32, #tpu.memory_space<vmem>>, vector<1x1x1x1x8x4xf32>
    %54 = vector.shape_cast %53 : vector<1x1x1x1x8x4xf32> to vector<1x8x4xf32>
    %c0_75 = arith.constant 0 : index
    %c1_76 = arith.constant 1 : index
    %c0_77 = arith.constant 0 : index
    %c1_78 = arith.constant 1 : index
    %c0_79 = arith.constant 0 : index
    %c0_80 = arith.constant 0 : index
    %55 = vector.load %arg2[%c0_75, %c1_76, %c0_77, %c1_78, %c0_79, %c0_80] : memref<1x8x2x2x9x4xf32, #tpu.memory_space<vmem>>, vector<1x7x1x1x8x4xf32>
    %56 = vector.shape_cast %55 : vector<1x7x1x1x8x4xf32> to vector<7x8x4xf32>
    %57 = tpu.concatenate %56, %54 in 0 : vector<7x8x4xf32>, vector<1x8x4xf32> -> vector<8x8x4xf32>
    %58 = vector.shape_cast %57 : vector<8x8x4xf32> to vector<64x4xf32>
    %c7 = arith.constant 7 : index
    %c0_81 = arith.constant 0 : index
    %c0_82 = arith.constant 0 : index
    %59 = vector.load %arg4[%c7, %c0_81, %c0_82] : memref<9x4x8xf32, #tpu.memory_space<vmem>>, vector<1x4x8xf32>
    %60 = vector.shape_cast %59 : vector<1x4x8xf32> to vector<4x8xf32>
    %cst_83 = arith.constant dense<0.000000e+00> : vector<64x8xf32>
    %61 = tpu.matmul %58, %60, %cst_83 {dimension_numbers = #tpu.dot_dimension_numbers<[1], [0], [0], [1], [0, 0, 1, 1], [], []>} : vector<64x4xf32>, vector<4x8xf32>, vector<64x8xf32> -> vector<64x8xf32>
    %62 = arith.addf %52, %61 : vector<64x8xf32>
    %c0_84 = arith.constant 0 : index
    %c0_85 = arith.constant 0 : index
    %c0_86 = arith.constant 0 : index
    %c0_87 = arith.constant 0 : index
    %c1_88 = arith.constant 1 : index
    %c0_89 = arith.constant 0 : index
    %63 = vector.load %arg3[%c0_84, %c0_85, %c0_86, %c0_87, %c1_88, %c0_89] : memref<1x1x2x2x9x4xf32, #tpu.memory_space<vmem>>, vector<1x1x1x1x8x4xf32>
    %64 = vector.shape_cast %63 : vector<1x1x1x1x8x4xf32> to vector<1x8x4xf32>
    %c0_90 = arith.constant 0 : index
    %c1_91 = arith.constant 1 : index
    %c0_92 = arith.constant 0 : index
    %c0_93 = arith.constant 0 : index
    %c1_94 = arith.constant 1 : index
    %c0_95 = arith.constant 0 : index
    %65 = vector.load %arg2[%c0_90, %c1_91, %c0_92, %c0_93, %c1_94, %c0_95] : memref<1x8x2x2x9x4xf32, #tpu.memory_space<vmem>>, vector<1x7x1x1x8x4xf32>
    %66 = vector.shape_cast %65 : vector<1x7x1x1x8x4xf32> to vector<7x8x4xf32>
    %67 = tpu.concatenate %66, %64 in 0 : vector<7x8x4xf32>, vector<1x8x4xf32> -> vector<8x8x4xf32>
    %68 = vector.shape_cast %67 : vector<8x8x4xf32> to vector<64x4xf32>
    %c8 = arith.constant 8 : index
    %c0_96 = arith.constant 0 : index
    %c0_97 = arith.constant 0 : index
    %69 = vector.load %arg4[%c8, %c0_96, %c0_97] : memref<9x4x8xf32, #tpu.memory_space<vmem>>, vector<1x4x8xf32>
    %70 = vector.shape_cast %69 : vector<1x4x8xf32> to vector<4x8xf32>
    %cst_98 = arith.constant dense<0.000000e+00> : vector<64x8xf32>
    %71 = tpu.matmul %68, %70, %cst_98 {dimension_numbers = #tpu.dot_dimension_numbers<[1], [0], [0], [1], [0, 0, 1, 1], [], []>} : vector<64x4xf32>, vector<4x8xf32>, vector<64x8xf32> -> vector<64x8xf32>
    %72 = arith.addf %62, %71 : vector<64x8xf32>
    %c0_99 = arith.constant 0 : index
    %c0_100 = arith.constant 0 : index
    %73 = vector.load %arg5[%c0_99, %c0_100] : memref<1x8xf32, #tpu.memory_space<vmem>>, vector<1x8xf32>
    %74 = vector.shape_cast %73 : vector<1x8xf32> to vector<8xf32>
    %75 = vector.shape_cast %74 : vector<8xf32> to vector<1x8xf32>
    %76 = vector.broadcast %75 : vector<1x8xf32> to vector<64x8xf32>
    %77 = arith.addf %72, %76 : vector<64x8xf32>
    %78 = vector.shape_cast %77 : vector<64x8xf32> to vector<8x8x8xf32>
    %c0_101 = arith.constant 0 : index
    %c0_102 = arith.constant 0 : index
    %c0_103 = arith.constant 0 : index
    %c0_104 = arith.constant 0 : index
    %79 = vector.load %arg6[%c0_101, %c0_102, %c0_103, %c0_104] : memref<1x8x8x8xf32, #tpu.memory_space<vmem>>, vector<1x8x8x8xf32>
    %80 = vector.shape_cast %79 : vector<1x8x8x8xf32> to vector<8x8x8xf32>
    %81 = vector.shape_cast %78 : vector<8x8x8xf32> to vector<1x8x8x8xf32>
    tpu.vector_store %arg6[%c0_101, %c0_102, %c0_103, %c0_104], %81 {strides = array<i32>} : memref<1x8x8x8xf32, #tpu.memory_space<vmem>>, vector<1x8x8x8xf32>,
    return
  }
  func.func @transform_0(%arg0: i32, %arg1: i32) -> (i32, i32, i32, i32, i32, i32) {
    %c0_i32 = arith.constant 0 : i32
    %c0_i32_0 = arith.constant 0 : i32
    %c0_i32_1 = arith.constant 0 : i32
    %c0_i32_2 = arith.constant 0 : i32
    %c0_i32_3 = arith.constant 0 : i32
    return %arg0, %arg1, %c0_i32, %c0_i32_0, %c0_i32_1, %c0_i32_2 : i32, i32, i32, i32, i32, i32
  }
  func.func @transform_1(%arg0: i32, %arg1: i32) -> (i32, i32, i32, i32, i32, i32) {
    %c1_i32 = arith.constant 1 : i32
    %0 = arith.addi %arg1, %c1_i32 : i32
    %c8_i32 = arith.constant 8 : i32
    %1 = arith.muli %0, %c8_i32 : i32
    %c0_i32 = arith.constant 0 : i32
    %c0_i32_0 = arith.constant 0 : i32
    %c0_i32_1 = arith.constant 0 : i32
    %c0_i32_2 = arith.constant 0 : i32
    %c0_i32_3 = arith.constant 0 : i32
    return %arg0, %1, %c0_i32, %c0_i32_0, %c0_i32_1, %c0_i32_2 : i32, i32, i32, i32, i32, i32
  }
  func.func @transform_2(%arg0: i32, %arg1: i32) -> (i32, i32, i32) {
    %c0_i32 = arith.constant 0 : i32
    %c0_i32_0 = arith.constant 0 : i32
    %c0_i32_1 = arith.constant 0 : i32
    %c0_i32_2 = arith.constant 0 : i32
    return %c0_i32, %c0_i32_0, %c0_i32_1 : i32, i32, i32
  }
  func.func @transform_3(%arg0: i32, %arg1: i32) -> (i32, i32) {
    %c0_i32 = arith.constant 0 : i32
    %c0_i32_0 = arith.constant 0 : i32
    %c0_i32_1 = arith.constant 0 : i32
    return %c0_i32, %c0_i32_0 : i32, i32
  }
  func.func @transform_4(%arg0: i32, %arg1: i32) -> (i32, i32, i32, i32) {
    %c0_i32 = arith.constant 0 : i32
    %c0_i32_0 = arith.constant 0 : i32
    %c0_i32_1 = arith.constant 0 : i32
    return %arg0, %arg1, %c0_i32, %c0_i32_0 : i32, i32, i32, i32
  }
}

</mosaic_0001>

<bundles_post_ra>
// kernel: spatial_downsample2x.1
= control target key start
LH: loop header
LB: loop body
LE: loop exit
PB: predicated region body
PF: predicated region fallthrough
CT: control target
= control target key end

     0   :  { %s1457_s15 = smov 0   ;;  %s1459_s16 = smov 0   ;;  %s1787_s0 = inlined_call_operand.vmem [shape: f32[6,9,2,2,9,4], index: 0, kind: input, shape index: {}, may-alias: {0,1}]   ;;  %s1788_s1 = inlined_call_operand.vmem [shape: f32[6,9,2,2,9,4], index: 1, kind: input, shape index: {}, may-alias: {0,1}]   ;;  %s1789_s2 = inlined_call_operand.vmem [shape: f32[9,4,8], index: 2, kind: input, shape index: {}]   ;;  %s1790_s3 = inlined_call_operand.vmem [shape: f32[1,8], index: 3, kind: input, shape index: {}]   ;;  %s1791_s4 = inlined_call_operand.vmem [shape: f32[6,8,8,8], index: 4, kind: output, shape index: {}]  }
   0x1   :  { %s1461_s17 = smov 0  }
   0x2 LB: > { %s26_s18 = sadd.s32 1, %s1426_s16  ;;  %p1224_p0 = scmp.ge.s32.totalorder %s1430_s17, 1  ;;  %s1430_s17 = sphi %s1461_s17, %s14_s17   ;;  %s1426_s16 = sphi %s1459_s16, %s1793_s16   ;;  %s1422_s15 = sphi %s1457_s15, %s1792_s15  }
   0x3   : > { %p28_p1 = scmp.ge.s32.totalorder %s26_s18, 6  ;;  %p222_p2 = scmp.lt.s32.totalorder %s1430_s17, 7 }
   0x5   : > { %s1795_s18 = smov (%p28_p1, %s26_s18), 0  ;;  %p223_p3 = pnand %p1224_p0, %p222_p2 }
   0x6   : > { %p283_p4 = scmp.lt.s32.totalorder (!%p223_p3), %s1422_s15, 5 }
   0x7   : > { %226 = sbr.rel (%p223_p3) target bundleno = 296 (0x128), region = 36 }
   0xc   : > { %v1237_v0 = vld [vmem:[%s1789_s2 + $0x4] sm:$0xf]  ;;  %vm368_vm0 = vcmask 1043456   ;;  %v1256_v1 = vld [vmem:[%s1789_s2 + $0x8] sm:$0xf]  ;;  %s1797_s15 = smov (!%p283_p4, %s1422_s15), 5 }
   0xd   : > { %1377 = vmatpush.msk.msra.mxu1 %vm368_vm0, %v1237_v0  ;;  %1378 = vmatpush.msk.msra.mxu2 %vm368_vm0, %v1237_v0  ;;  %v1274_v2 = vld [vmem:[%s1789_s2 + $0xc] sm:$0xf]  ;;  %v331_v3 = vld [vmem:[%s1789_s2] sm:$0xf]  ;;  %v1292_v4 = vld [vmem:[%s1789_s2 + $0x10] sm:$0xf] }
   0xe   : > { %1379 = vmatpush.msk.msra.mxu3 %vm368_vm0, %v1237_v0  ;;  %s1380_s29 = smul.u32 576, %s1797_s15  ;;  %1238 = vmatpush.msk.msra.mxu0 %vm368_vm0, %v1237_v0  ;;  %vm343_vm1 = vcmask 31744   ;;  %v1327_v5 = vld [vmem:[%s1789_s2 + $0x18] sm:$0xf]  ;;  %v1345_v6 = vld [vmem:[%s1789_s2 + $0x1c] sm:$0xf] }
   0xf   : > { %1257 = vmatpush.msk.msrb.mxu2 %vm368_vm0, %v1256_v1  ;;  %1247 = vmatpush.msk.msrb.mxu1 %vm368_vm0, %v331_v3  ;;  %v1310_v11 = vld [vmem:[%s1789_s2 + $0x14] sm:$0xf]  ;;  %v1362_v12 = vld [vmem:[%s1789_s2 + $0x20] sm:$0xf]  ;;  %s1376_s23 = sshll.u32 %s1797_s15, 6  ;;  %vm1100_vm2 = vcmask 64512  }
  0x10   : > { %1275 = vmatpush.msk.msrb.mxu3 %vm368_vm0, %v1274_v2  ;;  %1293 = vmatpush.msk.msrb.mxu0 %vm368_vm0, %v1292_v4  ;;  %s1506_s6 = scalar_lea.vmem %s1787_s0, %s1380_s29  ;;  %s1375_s19 = sadd.s32 512, %s1380_s29 }
  0x11   : > { %v1515_v7 = vld [vmem:[%s1506_s6 + $0x90] sm:$0xff]  ;;  %v323_v17 = vld [vmem:[%s1506_s6] sm:$0xff]  ;;  %s310_s22 = scalar_lea.vmem %s1788_s1, %s1375_s19  ;;  %s1731_s28 = scalar_lea.vmem %s1791_s4, %s1376_s23 }
  0x12   : > { %v1518_v8 = vld [vmem:[%s1506_s6 + $0x110] sm:$0xff]  ;;  %1241 = vmatmul.msk.f32.vlgmr.msra.gmra.mxu1 %vm343_vm1, %v1515_v7  ;;  %v481_v18 = vld [vmem:[%s1506_s6 + $0x1] sm:$0xff] }
  0x13   : > { %v1521_v9 = vld [vmem:[%s1506_s6 + $0x190] sm:$0xff]  ;;  %1243 = vmatmul.msk.f32.vlgmr.msra.gmra.mxu2 %vm343_vm1, %v1518_v8  ;;  %1311 = vmatpush.msk.msra.mxu1 %vm368_vm0, %v1310_v11  ;;  %v1266_v19 = vld [vmem:[%s1506_s6 + $0x20] sm:$0xff] }
  0x14   : > { %v1229_v10 = vld [vmem:[%s1506_s6 + $0x10] sm:$0xff]  ;;  %1245 = vmatmul.msk.f32.vlgmr.msra.gmra.mxu3 %vm343_vm1, %v1521_v9  ;;  %1328 = vmatpush.msk.msra.mxu2 %vm368_vm0, %v1327_v5  ;;  %v324_v21 = vld [vmem:[%s1506_s6 + $0x40] sm:$0xff] }
  0x15   : > { %1239 = vmatmul.msk.f32.vlgmr.msra.gmra.mxu0 %vm343_vm1, %v1229_v10  ;;  %1346 = vmatpush.msk.msra.mxu3 %vm368_vm0, %v1345_v6  ;;  %v1542_v13 = vld [vmem:[%s1506_s6 + $0xd0] sm:$0xff]  ;;  %v482_v22 = vld [vmem:[%s1506_s6 + $0x41] sm:$0xff] }
  0x16   : > { %1363 = vmatpush.msk.msra.mxu0 %vm368_vm0, %v1362_v12  ;;  %v1545_v14 = vld [vmem:[%s1506_s6 + $0x150] sm:$0xff]  ;;  %v1267_v23 = vld [vmem:[%s1506_s6 + $0x60] sm:$0xff] }
  0x17   : > { %v1548_v15 = vld [vmem:[%s1506_s6 + $0x1d0] sm:$0xff]  ;;  %v325_v25 = vld [vmem:[%s1506_s6 + $0x80] sm:$0xff] }
  0x18   : > { %v1551_v16 = vld [vmem:[%s1506_s6 + $0x50] sm:$0xff]  ;;  %v483_v26 = vld [vmem:[%s1506_s6 + $0x81] sm:$0xff] }
  0x19   : > { %v1284_v20 = vld [vmem:[%s1506_s6 + $0x30] sm:$0xff]  ;;  %v1268_v27 = vld [vmem:[%s1506_s6 + $0xa0] sm:$0xff] }
  0x1a   : > { %1242 = vmatmul.msk.f32.gmra.mxu1 %vm343_vm1, %v1542_v13  ;;  %v1285_v24 = vld [vmem:[%s1506_s6 + $0x70] sm:$0xff]  ;;  %v326_v29 = vld [vmem:[%s1506_s6 + $0xc0] sm:$0xff] }
  0x1b   : > { %1244 = vmatmul.msk.f32.gmra.mxu2 %vm343_vm1, %v1545_v14  ;;  %v1286_v28 = vld [vmem:[%s1506_s6 + $0xb0] sm:$0xff]  ;;  %v484_v30 = vld [vmem:[%s1506_s6 + $0xc1] sm:$0xff] }
  0x1c   : > { %1246 = vmatmul.msk.f32.gmra.mxu3 %vm343_vm1, %v1548_v15  ;;  %v1269_v31 = vld [vmem:[%s1506_s6 + $0xe0] sm:$0xff]  ;;  %v1287_v32 = vld [vmem:[%s1506_s6 + $0xf0] sm:$0xff] }
  0x1d   : > { %1240 = vmatmul.msk.f32.gmra.mxu0 %vm343_vm1, %v1551_v16  ;;  %v327_v33 = vld [vmem:[%s1506_s6 + $0x100] sm:$0xff]  ;;  %v1288_v36 = vld [vmem:[%s1506_s6 + $0x130] sm:$0xff] }
  0x1e   : > { %v485_v34 = vld [vmem:[%s1506_s6 + $0x101] sm:$0xff]  ;;  %v1289_v40 = vld [vmem:[%s1506_s6 + $0x170] sm:$0xff] }
  0x1f   : > { %v1270_v35 = vld [vmem:[%s1506_s6 + $0x120] sm:$0xff]  ;;  %v1290_v44 = vld [vmem:[%s1506_s6 + $0x1b0] sm:$0xff] }
  0x20   : > { %v328_v37 = vld [vmem:[%s1506_s6 + $0x140] sm:$0xff]  ;;  %v1291_v48 = vld [vmem:[%s1506_s6 + $0x1f0] sm:$0xff] }
  0x21   : > { %v486_v38 = vld [vmem:[%s1506_s6 + $0x141] sm:$0xff]  ;;  %v1337_v63 = vld [vmem:[%s310_s22 + $0x10] sm:$0xff] }
  0x22   : > { %1248 = vmatmul.msk.f32.vlgmr.msrb.gmra.mxu1 %vm343_vm1, %v323_v17  ;;  %v1271_v39 = vld [vmem:[%s1506_s6 + $0x160] sm:$0xff] }
  0x23   : > { %1258 = vmatmul.msk.f32.vlgmr.msrb.gmra.mxu2 %vm343_vm1, %v481_v18  ;;  %v329_v41 = vld [vmem:[%s1506_s6 + $0x180] sm:$0xff] }
  0x24   : > { %1276 = vmatmul.msk.f32.vlgmr.msrb.gmra.mxu3 %vm343_vm1, %v1266_v19  ;;  %v487_v42 = vld [vmem:[%s1506_s6 + $0x181] sm:$0xff] }
  0x25   : > { %1294 = vmatmul.msk.f32.vlgmr.msrb.gmra.mxu0 %vm343_vm1, %v1284_v20  ;;  %v1272_v43 = vld [vmem:[%s1506_s6 + $0x1a0] sm:$0xff] }
  0x26   : > { %v330_v45 = vld [vmem:[%s1506_s6 + $0x1c0] sm:$0xff] }
  0x27   : > { %v488_v46 = vld [vmem:[%s1506_s6 + $0x1c1] sm:$0xff] }
  0x28   : > { %v1273_v47 = vld [vmem:[%s1506_s6 + $0x1e0] sm:$0xff] }
  0x29   : > { %v1302_v49 = vld [vmem:[%s1506_s6 + $0x21] sm:$0xff] }
  0x2a   : > { %1249 = vmatmul.msk.f32.gmra.mxu1 %vm343_vm1, %v324_v21  ;;  %v1303_v50 = vld [vmem:[%s1506_s6 + $0x61] sm:$0xff] }
  0x2b   : > { %1259 = vmatmul.msk.f32.gmra.mxu2 %vm343_vm1, %v482_v22  ;;  %v1304_v51 = vld [vmem:[%s1506_s6 + $0xa1] sm:$0xff] }
  0x2c   : > { %1277 = vmatmul.msk.f32.gmra.mxu3 %vm343_vm1, %v1267_v23  ;;  %v1305_v52 = vld [vmem:[%s1506_s6 + $0xe1] sm:$0xff] }
  0x2d   : > { %1295 = vmatmul.msk.f32.gmra.mxu0 %vm343_vm1, %v1285_v24  ;;  %v1306_v53 = vld [vmem:[%s1506_s6 + $0x121] sm:$0xff] }
  0x2e   : > { %v1307_v54 = vld [vmem:[%s1506_s6 + $0x161] sm:$0xff] }
  0x2f   : > { %v1308_v56 = vld [vmem:[%s1506_s6 + $0x1a1] sm:$0xff] }
  0x30   : > { %v1309_v61 = vld [vmem:[%s1506_s6 + $0x1e1] sm:$0xff] }
  0x31   : > { %v827_v62 = vld [vmem:[%s310_s22] sm:$0xff] }
  0x32   : > { %1250 = vmatmul.msk.f32.gmra.mxu1 %vm343_vm1, %v325_v25  ;;  %v1002_v1 = vld [vmem:[%s310_s22 + $0x1] sm:$0xff] }
  0x33   : > { %1260 = vmatmul.msk.f32.gmra.mxu2 %vm343_vm1, %v483_v26 }
  0x34   : > { %1278 = vmatmul.msk.f32.gmra.mxu3 %vm343_vm1, %v1268_v27 }
  0x35   : > { %1296 = vmatmul.msk.f32.gmra.mxu0 %vm343_vm1, %v1286_v28 }
  0x3a   : > { %1251 = vmatmul.msk.f32.gmra.mxu1 %vm343_vm1, %v326_v29 }
  0x3b   : > { %1261 = vmatmul.msk.f32.gmra.mxu2 %vm343_vm1, %v484_v30 }
  0x3c   : > { %1279 = vmatmul.msk.f32.gmra.mxu3 %vm343_vm1, %v1269_v31 }
  0x3d   : > { %1297 = vmatmul.msk.f32.gmra.mxu0 %vm343_vm1, %v1287_v32 }
  0x42   : > { %1252 = vmatmul.msk.f32.gmra.mxu1 %vm343_vm1, %v327_v33 }
  0x43   : > { %1262 = vmatmul.msk.f32.gmra.mxu2 %vm343_vm1, %v485_v34 }
  0x44   : > { %1280 = vmatmul.msk.f32.gmra.mxu3 %vm343_vm1, %v1270_v35 }
  0x45   : > { %1298 = vmatmul.msk.f32.gmra.mxu0 %vm343_vm1, %v1288_v36 }
  0x4a   : > { %1253 = vmatmul.msk.f32.gmra.mxu1 %vm343_vm1, %v328_v37 }
  0x4b   : > { %1263 = vmatmul.msk.f32.gmra.mxu2 %vm343_vm1, %v486_v38 }
  0x4c   : > { %1281 = vmatmul.msk.f32.gmra.mxu3 %vm343_vm1, %v1271_v39 }
  0x4d   : > { %1299 = vmatmul.msk.f32.gmra.mxu0 %vm343_vm1, %v1289_v40 }
  0x52   : > { %1254 = vmatmul.msk.f32.gmra.mxu1 %vm343_vm1, %v329_v41 }
  0x53   : > { %1264 = vmatmul.msk.f32.gmra.mxu2 %vm343_vm1, %v487_v42 }
  0x54   : > { %1282 = vmatmul.msk.f32.gmra.mxu3 %vm343_vm1, %v1272_v43 }
  0x55   : > { %1300 = vmatmul.msk.f32.gmra.mxu0 %vm343_vm1, %v1290_v44 }
  0x5a   : > { %1255 = vmatmul.msk.f32.gmra.mxu1 %vm343_vm1, %v330_v45 }
  0x5b   : > { %1265 = vmatmul.msk.f32.gmra.mxu2 %vm343_vm1, %v488_v46 }
  0x5c   : > { %1283 = vmatmul.msk.f32.gmra.mxu3 %vm343_vm1, %v1273_v47 }
  0x5d   : > { %1301 = vmatmul.msk.f32.gmra.mxu0 %vm343_vm1, %v1291_v48 }
  0x62   : > { %1312 = vmatmul.msk.f32.vlgmr.msra.gmra.mxu1 %vm343_vm1, %v1302_v49 }
  0x63   : > { %1329 = vmatmul.msk.f32.vlgmr.msra.gmra.mxu2 %vm343_vm1, %v324_v21 }
  0x64   : > { %1347 = vmatmul.msk.f32.vlgmr.msra.gmra.mxu3 %vm343_vm1, %v1551_v16 }
  0x65   : > { %1364 = vmatmul.msk.f32.vlgmr.msra.gmra.mxu0 %vm343_vm1, %v482_v22 }
  0x6a   : > { %1313 = vmatmul.msk.f32.gmra.mxu1 %vm343_vm1, %v1303_v50 }
  0x6b   : > { %1330 = vmatmul.msk.f32.gmra.mxu2 %vm343_vm1, %v325_v25 }
  0x6c   : > { %1348 = vmatmul.msk.f32.gmra.mxu3 %vm343_vm1, %v1515_v7 }
  0x6d   : > { %1365 = vmatmul.msk.f32.gmra.mxu0 %vm343_vm1, %v483_v26 }
  0x72   : > { %1314 = vmatmul.msk.f32.gmra.mxu1 %vm343_vm1, %v1304_v51 }
  0x73   : > { %1331 = vmatmul.msk.f32.gmra.mxu2 %vm343_vm1, %v326_v29 }
  0x74   : > { %1349 = vmatmul.msk.f32.gmra.mxu3 %vm343_vm1, %v1542_v13 }
  0x75   : > { %1366 = vmatmul.msk.f32.gmra.mxu0 %vm343_vm1, %v484_v30 }
  0x7a   : > { %1315 = vmatmul.msk.f32.gmra.mxu1 %vm343_vm1, %v1305_v52  ;;  %v1726_v52 = vld [vmem:[%s1790_s3] ss:$0 sm:$0xff] }
  0x7b   : > { %1332 = vmatmul.msk.f32.gmra.mxu2 %vm343_vm1, %v327_v33 }
  0x7c   : > { %1350 = vmatmul.msk.f32.gmra.mxu3 %vm343_vm1, %v1518_v8 }
  0x7d   : > { %1367 = vmatmul.msk.f32.gmra.mxu0 %vm343_vm1, %v485_v34 }
  0x82   : > { %1316 = vmatmul.msk.f32.gmra.mxu1 %vm343_vm1, %v1306_v53 }
  0x83   : > { %1333 = vmatmul.msk.f32.gmra.mxu2 %vm343_vm1, %v328_v37 }
  0x84   : > { %1351 = vmatmul.msk.f32.gmra.mxu3 %vm343_vm1, %v1545_v14 }
  0x85   : > { %1368 = vmatmul.msk.f32.gmra.mxu0 %vm343_vm1, %v486_v38 }
  0x8a   : > { %1317 = vmatmul.msk.f32.gmra.mxu1 %vm343_vm1, %v1307_v54 }
  0x8b   : > { %1334 = vmatmul.msk.f32.gmra.mxu2 %vm343_vm1, %v329_v41 }
  0x8c   : > { %1352 = vmatmul.msk.f32.gmra.mxu3 %vm343_vm1, %v1521_v9 }
  0x8d   : > { %1369 = vmatmul.msk.f32.gmra.mxu0 %vm343_vm1, %v487_v42 }
  0x8f   : > { %v1661_v55 = vpop.f32.mrf.mxu1 }
  0x92   : > { %v389_v57 = vpop.f32.mrf.mxu0  ;;  %1318 = vmatmul.msk.f32.gmra.mxu1 %vm343_vm1, %v1308_v56 }
  0x93   : > { %1335 = vmatmul.msk.f32.gmra.mxu2 %vm343_vm1, %v330_v45 }
  0x94   : > { %1353 = vmatmul.msk.f32.gmra.mxu3 %vm343_vm1, %v1548_v15 }
  0x95   : > { %1370 = vmatmul.msk.f32.gmra.mxu0 %vm343_vm1, %v488_v46 }
  0x96   : > { %v1674_v58 = vpop.f32.mrf.mxu2 }
  0x97   : > { %v1676_v59 = vpop.f32.mrf.mxu3  ;;  %v1678_v60 = vpop.f32.mrf.mxu1 }
  0x9a   : > { %v392_v0 = vpop.f32.mrf.mxu0  ;;  %1319 = vmatmul.msk.f32.gmra.mxu1 %vm343_vm1, %v1309_v61 }
  0x9b   : > { %1336 = vmatmul.msk.f32.gmra.mxu2 %vm343_vm1, %v827_v62 }
  0x9c   : > { %1354 = vmatmul.msk.f32.gmra.mxu3 %vm343_vm1, %v1337_v63 }
  0x9d   : > { %1371 = vmatmul.msk.f32.gmra.mxu0 %vm343_vm1, %v1002_v1 }
  0x9e   : > { %v1685_v2 = vpop.f32.mrf.mxu2 }
  0x9f   : > { %v1687_v3 = vpop.f32.mrf.mxu3  ;;  %v457_v4 = vpop.f32.mrf.mxu1 }
  0xa0   : > { %v458_v33 = vadd.f32 %v457_v4, %v389_v57 }
  0xa2   : > { %v709_v5 = vpop.f32.mrf.mxu0 }
  0xa6   : > { %v535_v6 = vpop.f32.mrf.mxu2 }
  0xa7   : > { %v622_v7 = vpop.f32.mrf.mxu3  ;;  %v460_v8 = vpop.f32.mrf.mxu1  ;;  %v559_v35 = vadd.f32 %v535_v6, %v458_v33 }
  0xa8   : > { %v461_v40 = vadd.f32 %v460_v8, %v392_v0 }
  0xa9   : > { %v646_v37 = vadd.f32 %v622_v7, %v559_v35 }
  0xaa   : > { %v712_v9 = vpop.f32.mrf.mxu0 }
  0xab   : > { %v733_v42 = vadd.f32 %v709_v5, %v646_v37 }
  0xae   : > { %v538_v10 = vpop.f32.mrf.mxu2 }
  0xaf   : > { %v625_v11 = vpop.f32.mrf.mxu3  ;;  %v463_v12 = vpop.f32.mrf.mxu1  ;;  %v560_v43 = vadd.f32 %v538_v10, %v461_v40 }
  0xb0   : > { %v464_v50 = vadd.f32 %v463_v12, %v1661_v55 }
  0xb1   : > { %v647_v46 = vadd.f32 %v625_v11, %v560_v43 }
  0xb2   : > { %v715_v13 = vpop.f32.mrf.mxu0 }
  0xb3   : > { %v734_v54 = vadd.f32 %v712_v9, %v647_v46 }
  0xb6   : > { %v541_v14 = vpop.f32.mrf.mxu2 }
  0xb7   : > { %v628_v15 = vpop.f32.mrf.mxu3  ;;  %v466_v16 = vpop.f32.mrf.mxu1  ;;  %v561_v56 = vadd.f32 %v541_v14, %v464_v50 }
  0xb8   : > { %v467_v5 = vadd.f32 %v466_v16, %v1678_v60 }
  0xb9   : > { %v648_v63 = vadd.f32 %v628_v15, %v561_v56 }
  0xba   : > { %v1689_v17 = vpop.f32.mrf.mxu0 }
  0xbb   : > { %v735_v8 = vadd.f32 %v715_v13, %v648_v63 }
  0xbe   : > { %v544_v18 = vpop.f32.mrf.mxu2 }
  0xbf   : > { %v631_v19 = vpop.f32.mrf.mxu3  ;;  %v469_v20 = vpop.f32.mrf.mxu1  ;;  %v562_v9 = vadd.f32 %v544_v18, %v467_v5 }
  0xc1   : > { %v649_v33 = vadd.f32 %v631_v19, %v562_v9 }
  0xc2   : > { %v1691_v21 = vpop.f32.mrf.mxu0 }
  0xc3   : > { %v736_v16 = vadd.f32 %v1689_v17, %v649_v33 }
  0xc6   : > { %v1693_v22 = vpop.f32.mrf.mxu2 }
  0xc7   : > { %v1695_v23 = vpop.f32.mrf.mxu3  ;;  %v1697_v24 = vpop.f32.mrf.mxu1 }
  0xca   : > { %v1699_v25 = vpop.f32.mrf.mxu0 }
  0xce   : > { %v1701_v26 = vpop.f32.mrf.mxu2 }
  0xcf   : > { %v1703_v27 = vpop.f32.mrf.mxu3  ;;  %v1705_v28 = vpop.f32.mrf.mxu1 }
  0xd2   : > { %v1707_v29 = vpop.f32.mrf.mxu0 }
  0xd6   : > { %v1709_v30 = vpop.f32.mrf.mxu2 }
  0xd7   : > { %v1711_v31 = vpop.f32.mrf.mxu3  ;;  %v1713_v32 = vpop.f32.mrf.mxu1 }
  0xda   : > { %v1715_v34 = vpop.f32.mrf.mxu0 }
  0xde   : > { %v1717_v36 = vpop.f32.mrf.mxu2 }
  0xdf   : > { %v1719_v38 = vpop.f32.mrf.mxu3  ;;  %v795_v39 = vpop.f32.mrf.mxu1 }
  0xe0   : > { %v819_v44 = vadd.f32 %v795_v39, %v733_v42  ;;  %v470_v39 = vadd.f32 %v469_v20, %v1674_v58  ;;  %v473_v58 = vadd.f32 %v1697_v24, %v1685_v2  ;;  %v476_v2 = vadd.f32 %v1705_v28, %v1676_v59 }
  0xe1   : > { %v479_v59 = vadd.f32 %v1713_v32, %v1687_v3 }
  0xe2   : > { %v1056_v41 = vpop.f32.mrf.mxu0  ;;  %v563_v13 = vadd.f32 %v1693_v22, %v470_v39 }
  0xe4   : > { %v650_v19 = vadd.f32 %v1695_v23, %v563_v13 }
  0xe6   : > { %v882_v45 = vpop.f32.mrf.mxu2  ;;  %v737_v22 = vadd.f32 %v1691_v21, %v650_v19 }
  0xe7   : > { %v906_v47 = vadd.f32 %v882_v45, %v819_v44  ;;  %v970_v48 = vpop.f32.mrf.mxu3  ;;  %v798_v49 = vpop.f32.mrf.mxu1 }
  0xe8   : > { %v820_v61 = vadd.f32 %v798_v49, %v734_v54 }
  0xe9   : > { %v994_v51 = vadd.f32 %v970_v48, %v906_v47  ;;  %v564_v47 = vadd.f32 %v1701_v26, %v473_v58  ;;  %v565_v26 = vadd.f32 %v1709_v30, %v476_v2  ;;  %v566_v30 = vadd.f32 %v1717_v36, %v479_v59 }
  0xea   : > { %v1059_v53 = vpop.f32.mrf.mxu0 }
  0xeb   : > { %v1080_v57 = vadd.f32 %v1056_v41, %v994_v51  ;;  %v651_v23 = vadd.f32 %v1703_v27, %v564_v47  ;;  %v652_v27 = vadd.f32 %v1711_v31, %v565_v26  ;;  %v653_v9 = vadd.f32 %v1719_v38, %v566_v30 }
  0xed   : > { %v1092_v55 = vadd.f32 %v1726_v52, %v1080_v57  ;;  %v738_v21 = vadd.f32 %v1699_v25, %v651_v23  ;;  %v739_v28 = vadd.f32 %v1707_v29, %v652_v27  ;;  %v740_v29 = vadd.f32 %v1715_v34, %v653_v9 }
  0xee   : > { %v885_v62 = vpop.f32.mrf.mxu2 }
  0xef   : > { %1101 = vst.msk [vmem:[%s1731_s28] sm:$0xff] %vm1100_vm2, %v1092_v55  ;;  %v907_v0 = vadd.f32 %v885_v62, %v820_v61  ;;  %v973_v1 = vpop.f32.mrf.mxu3  ;;  %v801_v4 = vpop.f32.mrf.mxu1 }
  0xf0   : > { %v821_v11 = vadd.f32 %v801_v4, %v735_v8 }
  0xf1   : > { %v995_v6 = vadd.f32 %v973_v1, %v907_v0 }
  0xf2   : > { %v1062_v7 = vpop.f32.mrf.mxu0 }
  0xf3   : > { %v1081_v10 = vadd.f32 %v1059_v53, %v995_v6 }
  0xf5   : > { %v1093_v12 = vadd.f32 %v1726_v52, %v1081_v10 }
  0xf6   : > { %v888_v14 = vpop.f32.mrf.mxu2 }
  0xf7   : > { %1102 = vst.msk [vmem:[%s1731_s28 + $0x8] sm:$0xff] %vm1100_vm2, %v1093_v12  ;;  %v908_v15 = vadd.f32 %v888_v14, %v821_v11  ;;  %v976_v35 = vpop.f32.mrf.mxu3  ;;  %v804_v37 = vpop.f32.mrf.mxu1 }
  0xf8   : > { %v822_v41 = vadd.f32 %v804_v37, %v736_v16 }
  0xf9   : > { %v996_v40 = vadd.f32 %v976_v35, %v908_v15 }
  0xfa   : > { %v1065_v60 = vpop.f32.mrf.mxu0 }
  0xfb   : > { %v1082_v18 = vadd.f32 %v1062_v7, %v996_v40 }
  0xfd   : > { %v1094_v42 = vadd.f32 %v1726_v52, %v1082_v18 }
  0xfe   : > { %v891_v43 = vpop.f32.mrf.mxu2 }
  0xff   : > { %1103 = vst.msk [vmem:[%s1731_s28 + $0x10] sm:$0xff] %vm1100_vm2, %v1094_v42  ;;  %v909_v44 = vadd.f32 %v891_v43, %v822_v41  ;;  %v979_v45 = vpop.f32.mrf.mxu3  ;;  %v807_v46 = vpop.f32.mrf.mxu1 }
 0x100   : > { %v823_v49 = vadd.f32 %v807_v46, %v737_v22 }
 0x101   : > { %v997_v20 = vadd.f32 %v979_v45, %v909_v44 }
 0x102   : > { %v1068_v17 = vpop.f32.mrf.mxu0 }
 0x103   : > { %v1083_v48 = vadd.f32 %v1065_v60, %v997_v20 }
 0x105   : > { %v1095_v50 = vadd.f32 %v1726_v52, %v1083_v48 }
 0x106   : > { %v894_v51 = vpop.f32.mrf.mxu2 }
 0x107   : > { %1104 = vst.msk [vmem:[%s1731_s28 + $0x18] sm:$0xff] %vm1100_vm2, %v1095_v50  ;;  %v910_v53 = vadd.f32 %v894_v51, %v823_v49  ;;  %v982_v54 = vpop.f32.mrf.mxu3  ;;  %v810_v56 = vpop.f32.mrf.mxu1 }
 0x108   : > { %v824_v55 = vadd.f32 %v810_v56, %v738_v21 }
 0x109   : > { %v998_v24 = vadd.f32 %v982_v54, %v910_v53 }
 0x10a   : > { %v1071_v61 = vpop.f32.mrf.mxu0 }
 0x10b   : > { %v1084_v57 = vadd.f32 %v1068_v17, %v998_v24 }
 0x10d   : > { %v1096_v62 = vadd.f32 %v1726_v52, %v1084_v57 }
 0x10e   : > { %v897_v63 = vpop.f32.mrf.mxu2 }
 0x10f   : > { %1105 = vst.msk [vmem:[%s1731_s28 + $0x20] sm:$0xff] %vm1100_vm2, %v1096_v62  ;;  %v911_v0 = vadd.f32 %v897_v63, %v824_v55  ;;  %v985_v1 = vpop.f32.mrf.mxu3  ;;  %v813_v4 = vpop.f32.mrf.mxu1 }
 0x110   : > { %v825_v6 = vadd.f32 %v813_v4, %v739_v28 }
 0x111   : > { %v999_v25 = vadd.f32 %v985_v1, %v911_v0 }
 0x112   : > { %v1074_v31 = vpop.f32.mrf.mxu0 }
 0x113   : > { %v1085_v5 = vadd.f32 %v1071_v61, %v999_v25 }
 0x115   : > { %v1097_v7 = vadd.f32 %v1726_v52, %v1085_v5 }
 0x116   : > { %v900_v8 = vpop.f32.mrf.mxu2 }
 0x117   : > { %1106 = vst.msk [vmem:[%s1731_s28 + $0x28] sm:$0xff] %vm1100_vm2, %v1097_v7  ;;  %v912_v10 = vadd.f32 %v900_v8, %v825_v6  ;;  %v988_v11 = vpop.f32.mrf.mxu3  ;;  %v816_v32 = vpop.f32.mrf.mxu1 }
 0x118   : > { %v826_v36 = vadd.f32 %v816_v32, %v740_v29 }
 0x119   : > { %v1000_v3 = vadd.f32 %v988_v11, %v912_v10 }
 0x11a   : > { %v1077_v37 = vpop.f32.mrf.mxu0 }
 0x11b   : > { %v1086_v12 = vadd.f32 %v1074_v31, %v1000_v3 }
 0x11d   : > { %v1098_v14 = vadd.f32 %v1726_v52, %v1086_v12 }
 0x11e   : > { %v903_v33 = vpop.f32.mrf.mxu2 }
 0x11f   : > { %1107 = vst.msk [vmem:[%s1731_s28 + $0x30] sm:$0xff] %vm1100_vm2, %v1098_v14  ;;  %v913_v15 = vadd.f32 %v903_v33, %v826_v36  ;;  %v991_v35 = vpop.f32.mrf.mxu3 }
 0x121   : > { %v1001_v38 = vadd.f32 %v991_v35, %v913_v15 }
 0x123   : > { %v1087_v39 = vadd.f32 %v1077_v37, %v1001_v38 }
 0x125   : > { %v1099_v40 = vadd.f32 %v1726_v52, %v1087_v39 }
 0x127   : > { %1108 = vst.msk [vmem:[%s1731_s28 + $0x38] sm:$0xff] %vm1100_vm2, %v1099_v40 }
 0x128 PF: > { %s14_s17 = sadd.s32 1, %s1430_s17   ;;  %s1792_s15 = smov %s1426_s16 }
 0x129   : > { %p11_p5 = scmp.ge.s32.totalorder %s14_s17, 8   ;;  %s1793_s16 = smov %s1795_s18 }
 0x12b   :  { %13 = sbr.rel (!%p11_p5) target bundleno = 2 (0x2), region = 83 }

</bundles_post_ra>
